<compile_context>
chip_gen: v6e
topology: v6e:2x2x1
jax: 0.10.0
libtpu: 0.0.40
codegen_flags: <defaults>
</compile_context>

<pallas_src>
import functools

import jax
import jax.numpy as jnp
from jax.experimental import pallas as pl
from jax.experimental.pallas import tpu as pltpu

CIN = 16
COUT = 3
KH = KW = 3


def _pick_block_batch(n, max_b=8):
    """Largest divisor of n that is <= max_b (images per grid step)."""
    for b in range(min(n, max_b), 0, -1):
        if n % b == 0:
            return b
    return 1


def _conv_kernel(x_ref, w_ref, b_ref, o_ref, *, H, W):
    # x_ref: (B, CIN, H*W + 2*W + 2)  flat-padded NCHW input block
    # w_ref: (KW, COUT, KH*CIN)       per-kw weight groups (K axis = kh-major, c-minor)
    # b_ref: (COUT, 1)                bias column
    # o_ref: (B, COUT, H*W)           channel-major output block (reshape of NCHW)
    B = o_ref.shape[0]
    HW = H * W

    bias = b_ref[...]  # (COUT, 1), broadcasts along lanes

    # Lane-column masks: the flat layout wraps across row boundaries for the
    # horizontally shifted tap groups, so output column w==0 (kw==0 taps) and
    # w==W-1 (kw==2 taps) must be zeroed.  Applied post-matmul on (COUT, HW)
    # (masking commutes with the channel contraction: it is per-lane).
    col = jax.lax.broadcasted_iota(jnp.int32, (1, HW), 1) % W
    mask_l = (col != 0).astype(jnp.float32)
    mask_r = (col != W - 1).astype(jnp.float32)

    for b in range(B):
        xb = x_ref[b]  # (CIN, H*W + 2*W + 2)
        acc = jnp.zeros((COUT, HW), dtype=jnp.float32)
        for kw in range(KW):
            # Stack the 3 row-shifted contiguous lane-slices along the
            # contraction axis -> (KH*CIN, HW); one K=48 matmul per kw group.
            slab = jnp.concatenate(
                [xb[:, kh * W + kw: kh * W + kw + HW] for kh in range(KH)],
                axis=0)
            part = jnp.dot(w_ref[kw], slab,
                           preferred_element_type=jnp.float32)  # (COUT, HW)
            if kw == 0:
                part = part * mask_l
            elif kw == KW - 1:
                part = part * mask_r
            acc = acc + part
        o_ref[b] = (acc + bias).astype(o_ref.dtype)


def conv2d_3x3(x_nchw, weight, bias):
    """Conv2d(16, 3, kernel_size=3, stride=1, padding=1) forward.

    x_nchw : (N, 16, H, W) float32
    weight : (3, 16, 3, 3) float32   (PyTorch OIHW layout)
    bias   : (3,) float32
    returns: (N, 3, H, W) float32
    """
    N, Cin, H, W = x_nchw.shape
    assert Cin == CIN
    HW = H * W
    Lpad = HW + 2 * W + 2

    # NCHW stays put: flatten spatial dims (free) and zero-pad the flat axis.
    x_flat = x_nchw.reshape(N, CIN, HW)
    x_pad = jnp.pad(x_flat, ((0, 0), (0, 0), (W + 1, W + 1)))

    # OIHW -> (kw, COUT, kh*CIN): tiny weight repack, matches slab row order.
    w_grp = jnp.transpose(weight, (3, 0, 2, 1)).reshape(KW, COUT, KH * CIN)
    b_col = bias.reshape(COUT, 1)

    B = _pick_block_batch(N)
    grid = (N // B,)

    out_flat = pl.pallas_call(
        functools.partial(_conv_kernel, H=H, W=W),
        out_shape=jax.ShapeDtypeStruct((N, COUT, HW), x_nchw.dtype),
        grid_spec=pltpu.PrefetchScalarGridSpec(
            num_scalar_prefetch=0,
            grid=grid,
            in_specs=[
                pl.BlockSpec((B, CIN, Lpad), lambda n: (n, 0, 0)),
                pl.BlockSpec((KW, COUT, KH * CIN), lambda n: (0, 0, 0)),
                pl.BlockSpec((COUT, 1), lambda n: (0, 0)),
            ],
            out_specs=pl.BlockSpec((B, COUT, HW), lambda n: (n, 0, 0)),
        ),
        compiler_params=pltpu.CompilerParams(
            dimension_semantics=("parallel",),
            vmem_limit_bytes=32 * 1024 * 1024,
        ),
    )(x_pad, w_grp, b_col)

    # (N, COUT, H*W) -> (N, COUT, H, W): pure metadata reshape, no transpose.
    return out_flat.reshape(N, COUT, H, W)


def _reference_conv(x_nchw, weight, bias):
    out = jax.lax.conv_general_dilated(
        x_nchw, weight,
        window_strides=(1, 1), padding=((1, 1), (1, 1)),
        dimension_numbers=("NCHW", "OIHW", "NCHW"))
    return out + bias.reshape(1, COUT, 1, 1)


if __name__ == "__main__":
    key = jax.random.PRNGKey(0)
    kx, kw, kb = jax.random.split(key, 3)

    # Deterministic synthetic parameters (PyTorch Conv2d(16, 3, 3) shapes).
    fan_in = CIN * KH * KW
    bound = 1.0 / (fan_in ** 0.5)
    weight = jax.random.uniform(kw, (COUT, CIN, KH, KW),
                                minval=-bound, maxval=bound,
                                dtype=jnp.float32)
    bias = jax.random.uniform(kb, (COUT,), minval=-bound, maxval=bound,
                              dtype=jnp.float32)

    # Small input consistent with the module: N=2, C=16, H=W=16 (NCHW).
    x = jax.random.normal(kx, (2, CIN, 16, 16), dtype=jnp.float32)

    out = conv2d_3x3(x, weight, bias)
    out = jax.block_until_ready(out)

    ref = jax.block_until_ready(_reference_conv(x, weight, bias))
    assert out.shape == (2, COUT, 16, 16)
    assert jnp.allclose(out, ref, atol=1e-4, rtol=1e-4)

    print("KERNEL_OK")
</pallas_src>

<mosaic_0001>
module attributes {stable_mosaic.version = 11 : i64} {
  func.func @_conv_kernel(%arg0: i32, %arg1: memref<2x16x290xf32, #tpu.memory_space<vmem>>, %arg2: memref<3x3x48xf32, #tpu.memory_space<vmem>>, %arg3: memref<3x1xf32, #tpu.memory_space<vmem>>, %arg4: memref<2x3x256xf32, #tpu.memory_space<vmem>>) attributes {dimension_semantics = [#tpu.dimension_semantics<parallel>], iteration_bounds = array<i64: 1>, scalar_prefetch = 0 : i64, scratch_operands = 0 : i64, tpu.core_type = #tpu.core_type<tc>, window_params = [{transform_indices = @transform_0, window_bounds = array<i64: 2, 16, 290>}, {pipeline_mode = #tpu.pipeline_mode<synchronous>, transform_indices = @transform_1, window_bounds = array<i64: 3, 3, 48>}, {pipeline_mode = #tpu.pipeline_mode<synchronous>, transform_indices = @transform_2, window_bounds = array<i64: 3, 1>}, {transform_indices = @transform_3, window_bounds = array<i64: 2, 3, 256>}]} {
    %c0 = arith.constant 0 : index
    %c0_0 = arith.constant 0 : index
    %0 = vector.load %arg3[%c0, %c0_0] : memref<3x1xf32, #tpu.memory_space<vmem>>, vector<3x1xf32>
    %1 = tpu.iota {dimensions = array<i32: 1>} : vector<1x256xi32>
    %c16_i32 = arith.constant 16 : i32
    %c0_i32 = arith.constant 0 : i32
    %2 = arith.cmpi eq, %c16_i32, %c0_i32 : i32
    %c1_i32 = arith.constant 1 : i32
    %3 = arith.select %2, %c1_i32, %c16_i32 : i32
    %4 = vector.broadcast %3 : i32 to vector<1x256xi32>
    %5 = arith.remsi %1, %4 : vector<1x256xi32>
    %c0_i32_1 = arith.constant 0 : i32
    %6 = vector.broadcast %c0_i32_1 : i32 to vector<1x256xi32>
    %7 = arith.cmpi ne, %5, %6 : vector<1x256xi32>
    %c0_i32_2 = arith.constant 0 : i32
    %8 = vector.broadcast %c0_i32_2 : i32 to vector<1x256xi32>
    %9 = arith.cmpi slt, %5, %8 : vector<1x256xi32>
    %c0_i32_3 = arith.constant 0 : i32
    %10 = arith.cmpi slt, %3, %c0_i32_3 : i32
    %11 = vector.broadcast %10 : i1 to vector<1x256xi1>
    %12 = vector.broadcast %11 : vector<1x256xi1> to vector<1x256xi1>
    %13 = arith.xori %9, %12 : vector<1x256xi1>
    %14 = arith.andi %13, %7 : vector<1x256xi1>
    %15 = vector.broadcast %3 : i32 to vector<1x256xi32>
    %16 = arith.addi %5, %15 : vector<1x256xi32>
    %17 = arith.select %14, %16, %5 : vector<1x256xi1>, vector<1x256xi32>
    %c0_i32_4 = arith.constant 0 : i32
    %18 = vector.broadcast %c0_i32_4 : i32 to vector<1x256xi32>
    %19 = arith.cmpi ne, %17, %18 : vector<1x256xi32>
    %20 = arith.extui %19 : vector<1x256xi1> to vector<1x256xi32>
    %21 = arith.sitofp %20 : vector<1x256xi32> to vector<1x256xf32>
    %c15_i32 = arith.constant 15 : i32
    %22 = vector.broadcast %c15_i32 : i32 to vector<1x256xi32>
    %23 = arith.cmpi ne, %17, %22 : vector<1x256xi32>
    %24 = arith.extui %23 : vector<1x256xi1> to vector<1x256xi32>
    %25 = arith.sitofp %24 : vector<1x256xi32> to vector<1x256xf32>
    %c0_5 = arith.constant 0 : index
    %c0_6 = arith.constant 0 : index
    %c0_7 = arith.constant 0 : index
    %26 = vector.load %arg1[%c0_5, %c0_6, %c0_7] : memref<2x16x290xf32, #tpu.memory_space<vmem>>, vector<1x16x290xf32>
    %27 = vector.shape_cast %26 : vector<1x16x290xf32> to vector<16x290xf32>
    %cst = arith.constant 0.000000e+00 : f32
    %28 = vector.broadcast %cst : f32 to vector<3x256xf32>
    %29 = vector.extract_strided_slice %27 {offsets = [0, 0], sizes = [16, 256], strides = [1, 1]} : vector<16x290xf32> to vector<16x256xf32>
    %30 = vector.extract_strided_slice %27 {offsets = [0, 16], sizes = [16, 256], strides = [1, 1]} : vector<16x290xf32> to vector<16x256xf32>
    %31 = vector.extract_strided_slice %27 {offsets = [0, 32], sizes = [16, 256], strides = [1, 1]} : vector<16x290xf32> to vector<16x256xf32>
    %32 = tpu.concatenate %29, %30, %31 in 0 : vector<16x256xf32>, vector<16x256xf32>, vector<16x256xf32> -> vector<48x256xf32>
    %c0_8 = arith.constant 0 : index
    %c0_9 = arith.constant 0 : index
    %c0_10 = arith.constant 0 : index
    %33 = vector.load %arg2[%c0_8, %c0_9, %c0_10] : memref<3x3x48xf32, #tpu.memory_space<vmem>>, vector<1x3x48xf32>
    %34 = vector.shape_cast %33 : vector<1x3x48xf32> to vector<3x48xf32>
    %cst_11 = arith.constant dense<0.000000e+00> : vector<3x256xf32>
    %35 = tpu.matmul %34, %32, %cst_11 {dimension_numbers = #tpu.dot_dimension_numbers<[1], [0], [0], [1], [0, 0, 1, 1], [], []>} : vector<3x48xf32>, vector<48x256xf32>, vector<3x256xf32> -> vector<3x256xf32>
    %36 = vector.broadcast %21 : vector<1x256xf32> to vector<3x256xf32>
    %37 = arith.mulf %35, %36 : vector<3x256xf32>
    %38 = arith.addf %28, %37 : vector<3x256xf32>
    %39 = vector.extract_strided_slice %27 {offsets = [0, 1], sizes = [16, 256], strides = [1, 1]} : vector<16x290xf32> to vector<16x256xf32>
    %40 = vector.extract_strided_slice %27 {offsets = [0, 17], sizes = [16, 256], strides = [1, 1]} : vector<16x290xf32> to vector<16x256xf32>
    %41 = vector.extract_strided_slice %27 {offsets = [0, 33], sizes = [16, 256], strides = [1, 1]} : vector<16x290xf32> to vector<16x256xf32>
    %42 = tpu.concatenate %39, %40, %41 in 0 : vector<16x256xf32>, vector<16x256xf32>, vector<16x256xf32> -> vector<48x256xf32>
    %c1 = arith.constant 1 : index
    %c0_12 = arith.constant 0 : index
    %c0_13 = arith.constant 0 : index
    %43 = vector.load %arg2[%c1, %c0_12, %c0_13] : memref<3x3x48xf32, #tpu.memory_space<vmem>>, vector<1x3x48xf32>
    %44 = vector.shape_cast %43 : vector<1x3x48xf32> to vector<3x48xf32>
    %cst_14 = arith.constant dense<0.000000e+00> : vector<3x256xf32>
    %45 = tpu.matmul %44, %42, %cst_14 {dimension_numbers = #tpu.dot_dimension_numbers<[1], [0], [0], [1], [0, 0, 1, 1], [], []>} : vector<3x48xf32>, vector<48x256xf32>, vector<3x256xf32> -> vector<3x256xf32>
    %46 = arith.addf %38, %45 : vector<3x256xf32>
    %47 = vector.extract_strided_slice %27 {offsets = [0, 2], sizes = [16, 256], strides = [1, 1]} : vector<16x290xf32> to vector<16x256xf32>
    %48 = vector.extract_strided_slice %27 {offsets = [0, 18], sizes = [16, 256], strides = [1, 1]} : vector<16x290xf32> to vector<16x256xf32>
    %49 = vector.extract_strided_slice %27 {offsets = [0, 34], sizes = [16, 256], strides = [1, 1]} : vector<16x290xf32> to vector<16x256xf32>
    %50 = tpu.concatenate %47, %48, %49 in 0 : vector<16x256xf32>, vector<16x256xf32>, vector<16x256xf32> -> vector<48x256xf32>
    %c2 = arith.constant 2 : index
    %c0_15 = arith.constant 0 : index
    %c0_16 = arith.constant 0 : index
    %51 = vector.load %arg2[%c2, %c0_15, %c0_16] : memref<3x3x48xf32, #tpu.memory_space<vmem>>, vector<1x3x48xf32>
    %52 = vector.shape_cast %51 : vector<1x3x48xf32> to vector<3x48xf32>
    %cst_17 = arith.constant dense<0.000000e+00> : vector<3x256xf32>
    %53 = tpu.matmul %52, %50, %cst_17 {dimension_numbers = #tpu.dot_dimension_numbers<[1], [0], [0], [1], [0, 0, 1, 1], [], []>} : vector<3x48xf32>, vector<48x256xf32>, vector<3x256xf32> -> vector<3x256xf32>
    %54 = vector.broadcast %25 : vector<1x256xf32> to vector<3x256xf32>
    %55 = arith.mulf %53, %54 : vector<3x256xf32>
    %56 = arith.addf %46, %55 : vector<3x256xf32>
    %57 = vector.broadcast %0 : vector<3x1xf32> to vector<3x256xf32>
    %58 = arith.addf %56, %57 : vector<3x256xf32>
    %c0_18 = arith.constant 0 : index
    %c0_19 = arith.constant 0 : index
    %c0_20 = arith.constant 0 : index
    %59 = vector.load %arg4[%c0_18, %c0_19, %c0_20] : memref<2x3x256xf32, #tpu.memory_space<vmem>>, vector<1x3x256xf32>
    %60 = vector.shape_cast %59 : vector<1x3x256xf32> to vector<3x256xf32>
    %61 = vector.shape_cast %58 : vector<3x256xf32> to vector<1x3x256xf32>
    tpu.vector_store %arg4[%c0_18, %c0_19, %c0_20], %61 {strides = array<i32>} : memref<2x3x256xf32, #tpu.memory_space<vmem>>, vector<1x3x256xf32>,
    %c1_21 = arith.constant 1 : index
    %c0_22 = arith.constant 0 : index
    %c0_23 = arith.constant 0 : index
    %62 = vector.load %arg1[%c1_21, %c0_22, %c0_23] : memref<2x16x290xf32, #tpu.memory_space<vmem>>, vector<1x16x290xf32>
    %63 = vector.shape_cast %62 : vector<1x16x290xf32> to vector<16x290xf32>
    %cst_24 = arith.constant 0.000000e+00 : f32
    %64 = vector.broadcast %cst_24 : f32 to vector<3x256xf32>
    %65 = vector.extract_strided_slice %63 {offsets = [0, 0], sizes = [16, 256], strides = [1, 1]} : vector<16x290xf32> to vector<16x256xf32>
    %66 = vector.extract_strided_slice %63 {offsets = [0, 16], sizes = [16, 256], strides = [1, 1]} : vector<16x290xf32> to vector<16x256xf32>
    %67 = vector.extract_strided_slice %63 {offsets = [0, 32], sizes = [16, 256], strides = [1, 1]} : vector<16x290xf32> to vector<16x256xf32>
    %68 = tpu.concatenate %65, %66, %67 in 0 : vector<16x256xf32>, vector<16x256xf32>, vector<16x256xf32> -> vector<48x256xf32>
    %c0_25 = arith.constant 0 : index
    %c0_26 = arith.constant 0 : index
    %c0_27 = arith.constant 0 : index
    %69 = vector.load %arg2[%c0_25, %c0_26, %c0_27] : memref<3x3x48xf32, #tpu.memory_space<vmem>>, vector<1x3x48xf32>
    %70 = vector.shape_cast %69 : vector<1x3x48xf32> to vector<3x48xf32>
    %cst_28 = arith.constant dense<0.000000e+00> : vector<3x256xf32>
    %71 = tpu.matmul %70, %68, %cst_28 {dimension_numbers = #tpu.dot_dimension_numbers<[1], [0], [0], [1], [0, 0, 1, 1], [], []>} : vector<3x48xf32>, vector<48x256xf32>, vector<3x256xf32> -> vector<3x256xf32>
    %72 = vector.broadcast %21 : vector<1x256xf32> to vector<3x256xf32>
    %73 = arith.mulf %71, %72 : vector<3x256xf32>
    %74 = arith.addf %64, %73 : vector<3x256xf32>
    %75 = vector.extract_strided_slice %63 {offsets = [0, 1], sizes = [16, 256], strides = [1, 1]} : vector<16x290xf32> to vector<16x256xf32>
    %76 = vector.extract_strided_slice %63 {offsets = [0, 17], sizes = [16, 256], strides = [1, 1]} : vector<16x290xf32> to vector<16x256xf32>
    %77 = vector.extract_strided_slice %63 {offsets = [0, 33], sizes = [16, 256], strides = [1, 1]} : vector<16x290xf32> to vector<16x256xf32>
    %78 = tpu.concatenate %75, %76, %77 in 0 : vector<16x256xf32>, vector<16x256xf32>, vector<16x256xf32> -> vector<48x256xf32>
    %c1_29 = arith.constant 1 : index
    %c0_30 = arith.constant 0 : index
    %c0_31 = arith.constant 0 : index
    %79 = vector.load %arg2[%c1_29, %c0_30, %c0_31] : memref<3x3x48xf32, #tpu.memory_space<vmem>>, vector<1x3x48xf32>
    %80 = vector.shape_cast %79 : vector<1x3x48xf32> to vector<3x48xf32>
    %cst_32 = arith.constant dense<0.000000e+00> : vector<3x256xf32>
    %81 = tpu.matmul %80, %78, %cst_32 {dimension_numbers = #tpu.dot_dimension_numbers<[1], [0], [0], [1], [0, 0, 1, 1], [], []>} : vector<3x48xf32>, vector<48x256xf32>, vector<3x256xf32> -> vector<3x256xf32>
    %82 = arith.addf %74, %81 : vector<3x256xf32>
    %83 = vector.extract_strided_slice %63 {offsets = [0, 2], sizes = [16, 256], strides = [1, 1]} : vector<16x290xf32> to vector<16x256xf32>
    %84 = vector.extract_strided_slice %63 {offsets = [0, 18], sizes = [16, 256], strides = [1, 1]} : vector<16x290xf32> to vector<16x256xf32>
    %85 = vector.extract_strided_slice %63 {offsets = [0, 34], sizes = [16, 256], strides = [1, 1]} : vector<16x290xf32> to vector<16x256xf32>
    %86 = tpu.concatenate %83, %84, %85 in 0 : vector<16x256xf32>, vector<16x256xf32>, vector<16x256xf32> -> vector<48x256xf32>
    %c2_33 = arith.constant 2 : index
    %c0_34 = arith.constant 0 : index
    %c0_35 = arith.constant 0 : index
    %87 = vector.load %arg2[%c2_33, %c0_34, %c0_35] : memref<3x3x48xf32, #tpu.memory_space<vmem>>, vector<1x3x48xf32>
    %88 = vector.shape_cast %87 : vector<1x3x48xf32> to vector<3x48xf32>
    %cst_36 = arith.constant dense<0.000000e+00> : vector<3x256xf32>
    %89 = tpu.matmul %88, %86, %cst_36 {dimension_numbers = #tpu.dot_dimension_numbers<[1], [0], [0], [1], [0, 0, 1, 1], [], []>} : vector<3x48xf32>, vector<48x256xf32>, vector<3x256xf32> -> vector<3x256xf32>
    %90 = vector.broadcast %25 : vector<1x256xf32> to vector<3x256xf32>
    %91 = arith.mulf %89, %90 : vector<3x256xf32>
    %92 = arith.addf %82, %91 : vector<3x256xf32>
    %93 = vector.broadcast %0 : vector<3x1xf32> to vector<3x256xf32>
    %94 = arith.addf %92, %93 : vector<3x256xf32>
    %c1_37 = arith.constant 1 : index
    %c0_38 = arith.constant 0 : index
    %c0_39 = arith.constant 0 : index
    %95 = vector.load %arg4[%c1_37, %c0_38, %c0_39] : memref<2x3x256xf32, #tpu.memory_space<vmem>>, vector<1x3x256xf32>
    %96 = vector.shape_cast %95 : vector<1x3x256xf32> to vector<3x256xf32>
    %97 = vector.shape_cast %94 : vector<3x256xf32> to vector<1x3x256xf32>
    tpu.vector_store %arg4[%c1_37, %c0_38, %c0_39], %97 {strides = array<i32>} : memref<2x3x256xf32, #tpu.memory_space<vmem>>, vector<1x3x256xf32>,
    return
  }
  func.func @transform_0(%arg0: i32) -> (i32, i32, i32) {
    %c0_i32 = arith.constant 0 : i32
    %c0_i32_0 = arith.constant 0 : i32
    %c0_i32_1 = arith.constant 0 : i32
    return %arg0, %c0_i32, %c0_i32_0 : i32, i32, i32
  }
  func.func @transform_1(%arg0: i32) -> (i32, i32, i32) {
    %c0_i32 = arith.constant 0 : i32
    %c0_i32_0 = arith.constant 0 : i32
    %c0_i32_1 = arith.constant 0 : i32
    %c0_i32_2 = arith.constant 0 : i32
    return %c0_i32, %c0_i32_0, %c0_i32_1 : i32, i32, i32
  }
  func.func @transform_2(%arg0: i32) -> (i32, i32) {
    %c0_i32 = arith.constant 0 : i32
    %c0_i32_0 = arith.constant 0 : i32
    %c0_i32_1 = arith.constant 0 : i32
    return %c0_i32, %c0_i32_0 : i32, i32
  }
  func.func @transform_3(%arg0: i32) -> (i32, i32, i32) {
    %c0_i32 = arith.constant 0 : i32
    %c0_i32_0 = arith.constant 0 : i32
    %c0_i32_1 = arith.constant 0 : i32
    return %arg0, %c0_i32, %c0_i32_0 : i32, i32, i32
  }
}

</mosaic_0001>

<bundles_post_ra>
// kernel: tpu_custom_call.1
= control target key start
LH: loop header
LB: loop body
LE: loop exit
PB: predicated region body
PF: predicated region fallthrough
CT: control target
= control target key end

     0   :  { %8 = vsyncpa [#allocation3], 0  ;;  %s1354_s0 = inlined_call_operand.hbm [shape: f32[2,16,290], index: 0, kind: input, shape index: {}]   ;;  %s1355_s1 = inlined_call_operand.hbm [shape: f32[3,3,48], index: 1, kind: input, shape index: {}]   ;;  %s1356_s2 = inlined_call_operand.vmem [shape: f32[3,1], index: 2, kind: input, shape index: {}]   ;;  %s1357_s3 = inlined_call_operand.vmem [shape: f32[2,3,256], index: 3, kind: output, shape index: {}]  }
   0x1   :  { %9 = vsyncpa [#allocation5], 0  ;;  %s998_s12 = smov [#allocation2]  }
   0x2   :  { %s15_s13 = sshll.u32 %s998_s12, 4  ;;  %s16_s13 = int_to_ptr.vmem [resolvable:$true] %s15_s13 }
   0x3   :  { %s962_s14 = scalar_lea.vmem %s16_s13, 1536  ;;  %p967_p1 = scmp.lt.s32.totalorder %s16_s13, %s16_s13 }
   0x4   :  { %p963_p0 = scmp.ne.s32.totalorder %s16_s13, %s962_s14  ;;  %p968_p2 = scmp.lt.s32.totalorder %s962_s14, %s962_s14 }
   0x6   :  { %p969_p3 = por %p968_p2, %p967_p1 }
   0x8   :  { %p970_p4 = pnand %p969_p3, %p963_p0 }
   0xa   :  { %973 = shalt.err (!%p970_p4)
}
   0xb   :  { %s999_s15 = smov 384   ;;  %s1000_s16 = smov 24  }
   0xc   :  { %21 = dma.hbm_to_vmem [thread:$0]  %s1354_s0, 1536, %s16_s13, [#allocation3], %s999_s15, %s999_s15, %s1000_s16  }
   0xd   :  { %s1001_s19 = smov [#allocation4]  }
   0xe   :  { %s27_s20 = sshll.u32 %s1001_s19, 4  ;;  %s28_s20 = int_to_ptr.vmem [resolvable:$true] %s27_s20 }
   0xf   :  { %s982_s21 = scalar_lea.vmem %s28_s20, 192  ;;  %p987_p6 = scmp.lt.s32.totalorder %s28_s20, %s28_s20 }
  0x10   :  { %p983_p5 = scmp.ne.s32.totalorder %s28_s20, %s982_s21  ;;  %p988_p7 = scmp.lt.s32.totalorder %s982_s21, %s982_s21 }
  0x12   :  { %p989_p8 = por %p988_p7, %p987_p6 }
  0x14   :  { %p990_p9 = pnand %p989_p8, %p983_p5 }
  0x16   :  { %993 = shalt.err (!%p990_p9)
}
  0x17   :  { %s1002_s22 = smov 64   ;;  %s1003_s23 = smov 4  }
  0x18   :  { %33 = dma.hbm_to_vmem [thread:$0]  %s1355_s1, 192, %s28_s20, [#allocation5], %s1002_s22, %s1002_s22, %s1003_s23  }
  0x19   :  { %994 = dma.done.wait [#allocation3], 1536  }
  0x1a   :  { %995 = vsyncadd [#allocation3], 4294965760 }
  0x1b   :  { %996 = dma.done.wait [#allocation5], 192  }
  0x1c   :  { %997 = vsyncadd [#allocation5], 4294967104  ;;  %v1036_v0 = vld [vmem:[#allocation2 + $0x20] sm:$0xff]  ;;  %v1038_v1 = vld [vmem:[#allocation2 + $0x18] sm:$0xff]  ;;  %s1004_s0 = smov 96   ;;  %s1005_s1 = smov 112  }
  0x1d   :  { %123 = vrot.lane.b32.xlu0 %v1036_v0, %s1004_s0  ;;  %121 = vrot.lane.b32.xlu1 %v1038_v1, %s1004_s0  ;;  %v87_v2 = vld [vmem:[#allocation2 + $0x28] sm:$0xff]  ;;  %v84_v4 = vld [vmem:[#allocation2 + $0x10] sm:$0xff]  ;;  %v1045_v5 = vld [vmem:[#allocation2] sm:$0xff]  ;;  %s1006_s26 = smov 127   ;;  %s1007_s27 = smov 126   ;;  %vm127_vm0 = vcmask 785408  }
  0x1e   :  { %v1042_v3 = vld [vmem:[#allocation2 + $0x8] sm:$0xff]  ;;  %v1052_v6 = vld [vmem:[#allocation2 + $0x58] sm:$0xff]  ;;  %v1054_v7 = vld [vmem:[#allocation2 + $0x50] sm:$0xff]  ;;  %vm106_vm1 = vcmask 916480   ;;  %v1008_v33 = vmov 0.0   ;;  %vm137_vm2 = vcmask 392192  }
  0x1f   :  { %v1058_v8 = vld [vmem:[#allocation2 + $0x48] sm:$0xff]  ;;  %v1060_v9 = vld [vmem:[#allocation2 + $0x38] sm:$0xff]  ;;  %v1064_v10 = vld [vmem:[#allocation2 + $0x40] sm:$0xff]  ;;  %205 = vmatprep.mubr.f32.mxu0 %v1008_v33  ;;  %346 = vmatprep.mubr.f32.mxu1 %v1008_v33  ;;  %vm254_vm3 = vcmask 1039360   ;;  %vm393_vm4 = vcmask 1031168  }
  0x20   :  { %v1066_v11 = vld [vmem:[#allocation2 + $0x30] sm:$0xff]  ;;  %v136_v34 = vld [vmem:[#allocation4] sm:$0x7] }
  0x21   :  { %125 = vrot.lane.b32.xlu0 %v87_v2, %s1004_s0  ;;  %117 = vrot.lane.b32.xlu1 %v1042_v3, %s1004_s0 }
  0x25   :  { %119 = vrot.lane.b32.xlu0 %v84_v4, %s1004_s0  ;;  %115 = vrot.lane.b32.xlu1 %v1045_v5, %s1004_s0 }
  0x29   :  { %102 = vrot.lane.b32.xlu0 %v1036_v0, %s1005_s1  ;;  %104 = vrot.lane.b32.xlu1 %v87_v2, %s1005_s1 }
  0x2d   :  { %100 = vrot.lane.b32.xlu0 %v1038_v1, %s1005_s1  ;;  %96 = vrot.lane.b32.xlu1 %v1042_v3, %s1005_s1 }
  0x31   :  { %98 = vrot.lane.b32.xlu0 %v84_v4, %s1005_s1  ;;  %94 = vrot.lane.b32.xlu1 %v1045_v5, %s1005_s1 }
  0x35   :  { %551 = vrot.lane.b32.xlu1 %v1052_v6, %s1004_s0  ;;  %549 = vrot.lane.b32.xlu0 %v1054_v7, %s1004_s0 }
  0x39   :  { %547 = vrot.lane.b32.xlu0 %v1058_v8, %s1004_s0  ;;  %543 = vrot.lane.b32.xlu1 %v1060_v9, %s1004_s0 }
  0x3d   :  { %545 = vrot.lane.b32.xlu0 %v1064_v10, %s1004_s0  ;;  %541 = vrot.lane.b32.xlu1 %v1066_v11, %s1004_s0 }
  0x41   :  { %531 = vrot.lane.b32.xlu1 %v1052_v6, %s1005_s1  ;;  %529 = vrot.lane.b32.xlu0 %v1054_v7, %s1005_s1 }
  0x45   :  { %527 = vrot.lane.b32.xlu0 %v1058_v8, %s1005_s1  ;;  %523 = vrot.lane.b32.xlu1 %v1060_v9, %s1005_s1 }
  0x49   :  { %521 = vrot.lane.b32.xlu1 %v1066_v11, %s1005_s1  ;;  %525 = vrot.lane.b32.xlu0 %v1064_v10, %s1005_s1 }
  0x4d   :  { %228 = vrot.lane.b32.xlu1 %v87_v2, %s1006_s26  ;;  %226 = vrot.lane.b32.xlu0 %v1036_v0, %s1006_s26 }
  0x51   :  { %220 = vrot.lane.b32.xlu1 %v1042_v3, %s1006_s26  ;;  %224 = vrot.lane.b32.xlu0 %v1038_v1, %s1006_s26 }
  0x55   :  { %218 = vrot.lane.b32.xlu1 %v1045_v5, %s1006_s26  ;;  %222 = vrot.lane.b32.xlu0 %v84_v4, %s1006_s26 }
  0x59   :  { %367 = vrot.lane.b32.xlu1 %v87_v2, %s1007_s27  ;;  %365 = vrot.lane.b32.xlu0 %v1036_v0, %s1007_s27  ;;  %v1009_v2 = vmov 0  }
  0x5a   :  { %953 = vset.pattern.permute.xlu0 %v1009_v2 }
  0x5d   :  { %359 = vrot.lane.b32.xlu1 %v1042_v3, %s1007_s27  ;;  %363 = vrot.lane.b32.xlu0 %v1038_v1, %s1007_s27 }
  0x61   :  { %357 = vrot.lane.b32.xlu1 %v1045_v5, %s1007_s27  ;;  %361 = vrot.lane.b32.xlu0 %v84_v4, %s1007_s27 }
  0x8f   :  { %v124_v12 = vpop.permute.xlu0 %123  ;;  %v122_v13 = vpop.permute.xlu1 %121 }
  0x90   :  { %v130_v17 = vsel %vm127_vm0, %v122_v13, %v124_v12 }
  0x93   :  { %v126_v14 = vpop.permute.xlu0 %125  ;;  %v118_v15 = vpop.permute.xlu1 %117 }
  0x94   :  { %252 = vrot.lane.b32.xlu1 %v126_v14, %s1006_s26  ;;  %v131_v16 = vsel %vm127_vm0, %v124_v12, %v126_v14 }
  0x95   :  { %161 = vmatprep.subr.mxu0 %v131_v16 }
  0x96   :  { %162 = vmatpush1.msra.mxu0 %v130_v17 }
  0x97   :  { %v120_v18 = vpop.permute.xlu0 %119  ;;  %v116_v19 = vpop.permute.xlu1 %115 }
  0x98   :  { %246 = vrot.lane.b32.xlu0 %v120_v18, %s1006_s26  ;;  %v129_v20 = vsel %vm127_vm0, %v118_v15, %v120_v18  ;;  %v128_v21 = vsel %vm127_vm0, %v116_v19, %v118_v15 }
  0x99   :  { %163 = vmatprep.subr.mxu0 %v129_v20 }
  0x9a   :  { %164 = vmatpush1.msra.mxu0 %v128_v21 }
  0x9b   :  { %v103_v22 = vpop.permute.xlu0 %102  ;;  %v105_v23 = vpop.permute.xlu1 %104 }
  0x9c   :  { %240 = vrot.lane.b32.xlu1 %v105_v23, %s1006_s26  ;;  %v110_v24 = vsel %vm106_vm1, %v103_v22, %v105_v23 }
  0x9d   :  { %165 = vmatprep.subr.mxu0 %v110_v24 }
  0x9f   :  { %v101_v25 = vpop.permute.xlu0 %100  ;;  %v97_v26 = vpop.permute.xlu1 %96 }
  0xa0   :  { %391 = vrot.lane.b32.xlu1 %v126_v14, %s1007_s27  ;;  %v109_v27 = vsel %vm106_vm1, %v101_v25, %v103_v22 }
  0xa1   :  { %166 = vmatpush1.msra.mxu0 %v109_v27 }
  0xa3   :  { %v99_v28 = vpop.permute.xlu0 %98  ;;  %v95_v29 = vpop.permute.xlu1 %94 }
  0xa4   :  { %234 = vrot.lane.b32.xlu0 %v99_v28, %s1006_s26  ;;  %379 = vrot.lane.b32.xlu1 %v105_v23, %s1007_s27  ;;  %v108_v30 = vsel %vm106_vm1, %v97_v26, %v99_v28  ;;  %v107_v31 = vsel %vm106_vm1, %v95_v29, %v97_v26 }
  0xa5   :  { %167 = vmatprep.subr.mxu0 %v108_v30 }
  0xa6   :  { %168 = vmatpush1.msra.mxu0 %v107_v31 }
  0xa7   :  { %v552_v32 = vpop.permute.xlu1 %551  ;;  %169 = vmatprep.subr.mxu0 %v1036_v0  ;;  %v550_v35 = vpop.permute.xlu0 %549 }
  0xa8   :  { %385 = vrot.lane.b32.xlu0 %v120_v18, %s1007_s27  ;;  %675 = vrot.lane.b32.xlu1 %v552_v32, %s1006_s26  ;;  %v1142_v39 = vsel %vm127_vm0, %v550_v35, %v552_v32 }
  0xa9   :  { %170 = vmatpush1.msra.mxu0 %v1038_v1 }
  0xaa   :  { %171 = vmatprep.subr.mxu0 %v1042_v3 }
  0xab   :  { %172 = vmatpush1.msra.mxu0 %v1045_v5  ;;  %v548_v36 = vpop.permute.xlu0 %547  ;;  %v544_v37 = vpop.permute.xlu1 %543 }
  0xac   :  { %373 = vrot.lane.b32.xlu0 %v99_v28, %s1007_s27  ;;  %812 = vrot.lane.b32.xlu1 %v552_v32, %s1007_s27  ;;  %v1139_v38 = vsel %vm127_vm0, %v548_v36, %v550_v35 }
  0xad   :  { %934 = vmatmul.mubr.msk.f32.vlgmr.msra.gmra.mxu0 %vm137_vm2, %v136_v34 }
  0xae   :  { %485 = vmatprep.mubr.f32.mxu0 %v1008_v33 }
  0xaf   :  { %v542_v40 = vpop.permute.xlu1 %541  ;;  %v546_v41 = vpop.permute.xlu0 %545 }
  0xb0   :  { %250 = vrot.lane.b32.xlu0 %v131_v16, %s1006_s26  ;;  %244 = vrot.lane.b32.xlu1 %v129_v20, %s1006_s26  ;;  %v1155_v43 = vsel %vm127_vm0, %v544_v37, %v546_v41  ;;  %v1158_v44 = vsel %vm127_vm0, %v542_v40, %v544_v37 }
  0xb3   :  { %v532_v42 = vpop.permute.xlu1 %531  ;;  %v530_v46 = vpop.permute.xlu0 %529 }
  0xb4   :  { %248 = vrot.lane.b32.xlu0 %v130_v17, %s1006_s26  ;;  %242 = vrot.lane.b32.xlu1 %v128_v21, %s1006_s26  ;;  %v1171_v49 = vsel %vm106_vm1, %v530_v46, %v532_v42 }
  0xb7   :  { %v524_v45 = vpop.permute.xlu1 %523  ;;  %v528_v48 = vpop.permute.xlu0 %527 }
  0xb8   :  { %238 = vrot.lane.b32.xlu0 %v110_v24, %s1006_s26  ;;  %232 = vrot.lane.b32.xlu1 %v108_v30, %s1006_s26  ;;  %v1174_v50 = vsel %vm106_vm1, %v528_v48, %v530_v46 }
  0xbb   :  { %v522_v47 = vpop.permute.xlu1 %521  ;;  %v526_v52 = vpop.permute.xlu0 %525 }
  0xbc   :  { %236 = vrot.lane.b32.xlu0 %v109_v27, %s1006_s26  ;;  %230 = vrot.lane.b32.xlu1 %v107_v31, %s1006_s26  ;;  %v1193_v55 = vsel %vm106_vm1, %v524_v45, %v526_v52  ;;  %v1196_v56 = vsel %vm106_vm1, %v522_v47, %v524_v45  ;;  %v217_v45 = vld [vmem:[#allocation4 + $0x4] sm:$0x7] }
  0xbf   :  { %v1176_v51 = vpop.permute.xlu1 %228  ;;  %v1187_v54 = vpop.permute.xlu0 %226 }
  0xc0   :  { %389 = vrot.lane.b32.xlu0 %v131_v16, %s1007_s27  ;;  %383 = vrot.lane.b32.xlu1 %v129_v20, %s1007_s27  ;;  %v258_v37 = vsel %vm254_vm3, %v1187_v54, %v1176_v51 }
  0xc3   :  { %v1185_v53 = vpop.permute.xlu1 %220  ;;  %v1204_v58 = vpop.permute.xlu0 %224 }
  0xc4   :  { %387 = vrot.lane.b32.xlu0 %v130_v17, %s1007_s27  ;;  %381 = vrot.lane.b32.xlu1 %v128_v21, %s1007_s27  ;;  %v257_v40 = vsel %vm254_vm3, %v1204_v58, %v1187_v54 }
  0xc7   :  { %v1198_v57 = vpop.permute.xlu1 %218  ;;  %v1212_v60 = vpop.permute.xlu0 %222 }
  0xc8   :  { %377 = vrot.lane.b32.xlu0 %v110_v24, %s1007_s27  ;;  %371 = vrot.lane.b32.xlu1 %v108_v30, %s1007_s27  ;;  %v255_v46 = vsel %vm254_vm3, %v1198_v57, %v1185_v53 }
  0xcb   :  { %v1208_v59 = vpop.permute.xlu1 %367  ;;  %v1220_v62 = vpop.permute.xlu0 %365 }
  0xcc   :  { %375 = vrot.lane.b32.xlu0 %v109_v27, %s1007_s27  ;;  %369 = vrot.lane.b32.xlu1 %v107_v31, %s1007_s27 }
  0xcf   :  { %v1218_v61 = vpop.permute.xlu1 %359  ;;  %v1232_v0 = vpop.permute.xlu0 %363 }
  0xd0   :  { %673 = vrot.lane.b32.xlu0 %v1142_v39, %s1006_s26  ;;  %808 = vrot.lane.b32.xlu1 %v1139_v38, %s1007_s27 }
  0xd3   :  { %v1226_v63 = vpop.permute.xlu1 %357  ;;  %v1238_v3 = vpop.permute.xlu0 %361 }
  0xd4   :  { %810 = vrot.lane.b32.xlu0 %v1142_v39, %s1007_s27  ;;  %669 = vrot.lane.b32.xlu1 %v546_v41, %s1006_s26 }
  0xd8   :  { %671 = vrot.lane.b32.xlu0 %v1139_v38, %s1006_s26  ;;  %806 = vrot.lane.b32.xlu1 %v546_v41, %s1007_s27 }
  0xdc   :  { %667 = vrot.lane.b32.xlu0 %v1155_v43, %s1006_s26  ;;  %802 = vrot.lane.b32.xlu1 %v1158_v44, %s1007_s27 }
  0xe0   :  { %804 = vrot.lane.b32.xlu0 %v1155_v43, %s1007_s27  ;;  %663 = vrot.lane.b32.xlu1 %v532_v42, %s1006_s26 }
  0xe4   :  { %665 = vrot.lane.b32.xlu0 %v1158_v44, %s1006_s26  ;;  %800 = vrot.lane.b32.xlu1 %v532_v42, %s1007_s27  ;;  %v256_v42 = vsel %vm254_vm3, %v1185_v53, %v1212_v60 }
  0xe8   :  { %661 = vrot.lane.b32.xlu0 %v1171_v49, %s1006_s26  ;;  %796 = vrot.lane.b32.xlu1 %v1174_v50, %s1007_s27 }
  0xec   :  { %798 = vrot.lane.b32.xlu0 %v1171_v49, %s1007_s27  ;;  %657 = vrot.lane.b32.xlu1 %v526_v52, %s1006_s26 }
  0xf0   :  { %659 = vrot.lane.b32.xlu0 %v1174_v50, %s1006_s26  ;;  %794 = vrot.lane.b32.xlu1 %v526_v52, %s1007_s27 }
  0xf4   :  { %655 = vrot.lane.b32.xlu0 %v1193_v55, %s1006_s26  ;;  %790 = vrot.lane.b32.xlu1 %v1196_v56, %s1007_s27 }
  0xf8   :  { %792 = vrot.lane.b32.xlu0 %v1193_v55, %s1007_s27  ;;  %651 = vrot.lane.b32.xlu1 %v1052_v6, %s1006_s26 }
  0xfc   :  { %653 = vrot.lane.b32.xlu0 %v1196_v56, %s1006_s26  ;;  %788 = vrot.lane.b32.xlu1 %v1052_v6, %s1007_s27 }
 0x100   :  { %649 = vrot.lane.b32.xlu0 %v1054_v7, %s1006_s26  ;;  %784 = vrot.lane.b32.xlu1 %v1058_v8, %s1007_s27 }
 0x104   :  { %786 = vrot.lane.b32.xlu0 %v1054_v7, %s1007_s27  ;;  %645 = vrot.lane.b32.xlu1 %v1064_v10, %s1006_s26 }
 0x106   :  { %v253_v1 = vpop.permute.xlu1 %252 }
 0x108   :  { %647 = vrot.lane.b32.xlu0 %v1058_v8, %s1006_s26  ;;  %782 = vrot.lane.b32.xlu1 %v1064_v10, %s1007_s27  ;;  %v42_v10 = vld [vmem:[%s1356_s2] sm:$0x7] }
 0x10a   :  { %v247_v5 = vpop.permute.xlu0 %246 }
 0x10c   :  { %643 = vrot.lane.b32.xlu0 %v1060_v9, %s1006_s26  ;;  %778 = vrot.lane.b32.xlu1 %v1066_v11, %s1007_s27 }
 0x10e   :  { %v241_v4 = vpop.permute.xlu1 %240 }
 0x110   :  { %780 = vrot.lane.b32.xlu0 %v1060_v9, %s1007_s27 }
 0x112   :  { %v392_v6 = vpop.permute.xlu1 %391 }
 0x114   :  { %641 = vrot.lane.b32.xlu0 %v1066_v11, %s1006_s26 }
 0x116   :  { %v235_v12 = vpop.permute.xlu0 %234  ;;  %v380_v13 = vpop.permute.xlu1 %379 }
 0x118   :  { %498 = vperm.xlu0 %953, %v42_v10  }
 0x11a   :  { %v386_v14 = vpop.permute.xlu0 %385  ;;  %v1251_v15 = vpop.permute.xlu1 %675 }
 0x11e   :  { %v1253_v16 = vpop.permute.xlu0 %373  ;;  %v1255_v17 = vpop.permute.xlu1 %812 }
 0x122   :  { %v251_v18 = vpop.permute.xlu0 %250  ;;  %v245_v19 = vpop.permute.xlu1 %244 }
 0x123   :  { %v266_v20 = vsel %vm254_vm3, %v251_v18, %v253_v1  ;;  %v264_v24 = vsel %vm254_vm3, %v245_v19, %v247_v5 }
 0x124   :  { %302 = vmatprep.subr.mxu1 %v266_v20 }
 0x126   :  { %v249_v21 = vpop.permute.xlu0 %248  ;;  %v243_v22 = vpop.permute.xlu1 %242 }
 0x127   :  { %v265_v23 = vsel %vm254_vm3, %v249_v21, %v251_v18  ;;  %v263_v25 = vsel %vm254_vm3, %v243_v22, %v245_v19 }
 0x128   :  { %303 = vmatpush1.msra.mxu1 %v265_v23 }
 0x129   :  { %304 = vmatprep.subr.mxu1 %v264_v24 }
 0x12a   :  { %v239_v26 = vpop.permute.xlu0 %238  ;;  %305 = vmatpush1.msra.mxu1 %v263_v25  ;;  %v233_v27 = vpop.permute.xlu1 %232 }
 0x12b   :  { %v262_v28 = vsel %vm254_vm3, %v239_v26, %v241_v4  ;;  %v260_v32 = vsel %vm254_vm3, %v233_v27, %v235_v12 }
 0x12c   :  { %306 = vmatprep.subr.mxu1 %v262_v28 }
 0x12e   :  { %v237_v29 = vpop.permute.xlu0 %236  ;;  %v231_v30 = vpop.permute.xlu1 %230 }
 0x12f   :  { %v261_v31 = vsel %vm254_vm3, %v237_v29, %v239_v26  ;;  %v259_v34 = vsel %vm254_vm3, %v231_v30, %v233_v27 }
 0x130   :  { %307 = vmatpush1.msra.mxu1 %v261_v31 }
 0x131   :  { %308 = vmatprep.subr.mxu1 %v260_v32 }
 0x132   :  { %v390_v35 = vpop.permute.xlu0 %389  ;;  %309 = vmatpush1.msra.mxu1 %v259_v34  ;;  %v384_v36 = vpop.permute.xlu1 %383 }
 0x133   :  { %310 = vmatprep.subr.mxu1 %v258_v37  ;;  %v405_v41 = vsel %vm393_vm4, %v390_v35, %v392_v6  ;;  %v403_v52 = vsel %vm393_vm4, %v384_v36, %v386_v14 }
 0x134   :  { %311 = vmatpush1.msra.mxu1 %v257_v40  ;;  %441 = vmatprep.subr.mxu0 %v405_v41 }
 0x135   :  { %312 = vmatprep.subr.mxu1 %v256_v42 }
 0x136   :  { %v388_v47 = vpop.permute.xlu0 %387  ;;  %313 = vmatpush1.msra.mxu1 %v255_v46  ;;  %v382_v48 = vpop.permute.xlu1 %381 }
 0x137   :  { %v404_v51 = vsel %vm393_vm4, %v388_v47, %v390_v35  ;;  %585 = vmatprep.subr.mxu1 %v1142_v39  ;;  %935 = vmatmul.mubr.msk.f32.vlgmr.msra.gmra.mxu1 %vm137_vm2, %v217_v45  ;;  %v402_v54 = vsel %vm393_vm4, %v382_v48, %v384_v36 }
 0x138   :  { %442 = vmatpush1.msra.mxu0 %v404_v51  ;;  %586 = vmatpush1.msra.mxu1 %v1139_v38 }
 0x139   :  { %443 = vmatprep.subr.mxu0 %v403_v52  ;;  %587 = vmatprep.subr.mxu1 %v1155_v43 }
 0x13a   :  { %v378_v53 = vpop.permute.xlu0 %377  ;;  %444 = vmatpush1.msra.mxu0 %v402_v54  ;;  %588 = vmatpush1.msra.mxu1 %v1158_v44  ;;  %v372_v57 = vpop.permute.xlu1 %371 }
 0x13b   :  { %589 = vmatprep.subr.mxu1 %v1171_v49  ;;  %v401_v39 = vsel %vm393_vm4, %v378_v53, %v380_v13  ;;  %629 = vmatprep.mubr.f32.mxu1 %v1008_v33  ;;  %v399_v44 = vsel %vm393_vm4, %v372_v57, %v1253_v16  ;;  %v561_v49 = vld [vmem:[#allocation4] sm:$0x7] }
 0x13c   :  { %445 = vmatprep.subr.mxu0 %v401_v39  ;;  %590 = vmatpush1.msra.mxu1 %v1174_v50 }
 0x13d   :  { %591 = vmatprep.subr.mxu1 %v1193_v55 }
 0x13e   :  { %v376_v38 = vpop.permute.xlu0 %375  ;;  %592 = vmatpush1.msra.mxu1 %v1196_v56  ;;  %v370_v43 = vpop.permute.xlu1 %369  ;;  %v397_v56 = vsel %vm393_vm4, %v1220_v62, %v1208_v59  ;;  %v394_v59 = vsel %vm393_vm4, %v1226_v63, %v1218_v61 }
 0x13f   :  { %v400_v58 = vsel %vm393_vm4, %v376_v38, %v378_v53  ;;  %593 = vmatprep.subr.mxu1 %v1054_v7  ;;  %v398_v60 = vsel %vm393_vm4, %v370_v43, %v372_v57  ;;  %v396_v7 = vsel %vm393_vm4, %v1232_v0, %v1220_v62 }
 0x140   :  { %446 = vmatpush1.msra.mxu0 %v400_v58  ;;  %594 = vmatpush1.msra.mxu1 %v1058_v8  ;;  %v395_v8 = vsel %vm393_vm4, %v1218_v61, %v1238_v3 }
 0x141   :  { %447 = vmatprep.subr.mxu0 %v399_v44  ;;  %595 = vmatprep.subr.mxu1 %v1060_v9  ;;  %v356_v9 = vld [vmem:[#allocation4 + $0x8] sm:$0x7] }
 0x142   :  { %v674_v50 = vpop.permute.xlu0 %673  ;;  %448 = vmatpush1.msra.mxu0 %v398_v60  ;;  %v809_v55 = vpop.permute.xlu1 %808  ;;  %596 = vmatpush1.msra.mxu1 %v1066_v11 }
 0x143   :  { %449 = vmatprep.subr.mxu0 %v397_v56  ;;  %937 = vmatmul.mubr.msk.f32.vlgmr.msra.gmra.mxu1 %vm137_vm2, %v561_v49  ;;  %v688_v62 = vsel %vm254_vm3, %v674_v50, %v1251_v15  ;;  %v777_v49 = vld [vmem:[#allocation4 + $0x8] sm:$0x7]  ;;  %v43_v56 = vlaneseq }
 0x144   :  { %450 = vmatpush1.msra.mxu0 %v396_v7  ;;  %905 = vmatprep.mubr.f32.mxu1 %v1008_v33 }
 0x145   :  { %451 = vmatprep.subr.mxu0 %v395_v8  ;;  %v44_v7 = vand.u32 127, %v43_v56 }
 0x146   :  { %v811_v11 = vpop.permute.xlu0 %810  ;;  %452 = vmatpush1.msra.mxu0 %v394_v59  ;;  %v670_v1 = vpop.permute.xlu1 %669 }
 0x147   :  { %v824_v0 = vsel %vm393_vm4, %v809_v55, %v811_v11  ;;  %724 = vmatprep.subr.mxu0 %v688_v62  ;;  %v825_v2 = vsel %vm393_vm4, %v811_v11, %v1255_v17  ;;  %936 = vmatmul.mubr.msk.f32.vlgmr.msra.gmra.mxu0 %vm137_vm2, %v356_v9  ;;  %v45_v8 = vadd.s32 128, %v44_v7  ;;  %v50_v9 = vand.u32 15, %v44_v7 }
 0x148   :  { %861 = vmatprep.subr.mxu1 %v825_v2  ;;  %768 = vmatprep.mubr.f32.mxu0 %v1008_v33 }
 0x149   :  { %862 = vmatpush1.msra.mxu1 %v824_v0  ;;  %v57_v59 = vand.u32 15, %v45_v8  ;;  %vm70_vm5 = vcmp.ne.s32.totalorder %v50_v9, 0  ;;  %vm76_vm7 = vcmp.ne.s32.totalorder %v50_v9, 15 }
 0x14a   :  { %v672_v61 = vpop.permute.xlu0 %671  ;;  %v807_v63 = vpop.permute.xlu1 %806  ;;  %v930_v11 = vsel %vm70_vm5, 1.0, %v1008_v33 }
 0x14b   :  { %v687_v3 = vsel %vm254_vm3, %v672_v61, %v674_v50  ;;  %v640_v50 = vld [vmem:[#allocation4 + $0x4] sm:$0x7]  ;;  %vm71_vm6 = vcmp.ne.s32.totalorder %v57_v59, 0  ;;  %vm77_vm8 = vcmp.ne.s32.totalorder %v57_v59, 15 }
 0x14c   :  { %725 = vmatpush1.msra.mxu0 %v687_v3  ;;  %v931_v62 = vsel %vm71_vm6, 1.0, %v1008_v33  ;;  %v932_v3 = vsel %vm76_vm7, 1.0, %v1008_v33 }
 0x14e   :  { %v668_v4 = vpop.permute.xlu0 %667  ;;  %v803_v5 = vpop.permute.xlu1 %802 }
 0x14f   :  { %v686_v6 = vsel %vm254_vm3, %v668_v4, %v670_v1 }
 0x150   :  { %726 = vmatprep.subr.mxu0 %v686_v6 }
 0x152   :  { %v805_v10 = vpop.permute.xlu0 %804  ;;  %v664_v12 = vpop.permute.xlu1 %663 }
 0x153   :  { %v822_v13 = vsel %vm393_vm4, %v803_v5, %v805_v10  ;;  %v823_v14 = vsel %vm393_vm4, %v805_v10, %v807_v63  ;;  %v933_v10 = vsel %vm77_vm8, 1.0, %v1008_v33 }
 0x154   :  { %863 = vmatprep.subr.mxu1 %v823_v14 }
 0x155   :  { %864 = vmatpush1.msra.mxu1 %v822_v13 }
 0x156   :  { %v666_v15 = vpop.permute.xlu0 %665  ;;  %v801_v16 = vpop.permute.xlu1 %800 }
 0x157   :  { %v685_v17 = vsel %vm254_vm3, %v666_v15, %v668_v4 }
 0x158   :  { %727 = vmatpush1.msra.mxu0 %v685_v17 }
 0x15a   :  { %v662_v18 = vpop.permute.xlu0 %661  ;;  %v797_v19 = vpop.permute.xlu1 %796 }
 0x15b   :  { %v684_v20 = vsel %vm254_vm3, %v662_v18, %v664_v12 }
 0x15c   :  { %728 = vmatprep.subr.mxu0 %v684_v20 }
 0x15e   :  { %v799_v21 = vpop.permute.xlu0 %798  ;;  %v658_v22 = vpop.permute.xlu1 %657 }
 0x15f   :  { %v820_v23 = vsel %vm393_vm4, %v797_v19, %v799_v21  ;;  %v821_v24 = vsel %vm393_vm4, %v799_v21, %v801_v16 }
 0x160   :  { %865 = vmatprep.subr.mxu1 %v821_v24 }
 0x161   :  { %866 = vmatpush1.msra.mxu1 %v820_v23 }
 0x162   :  { %v660_v25 = vpop.permute.xlu0 %659  ;;  %v795_v26 = vpop.permute.xlu1 %794 }
 0x163   :  { %v683_v27 = vsel %vm254_vm3, %v660_v25, %v662_v18 }
 0x164   :  { %729 = vmatpush1.msra.mxu0 %v683_v27 }
 0x166   :  { %v656_v28 = vpop.permute.xlu0 %655  ;;  %v791_v29 = vpop.permute.xlu1 %790 }
 0x167   :  { %v682_v30 = vsel %vm254_vm3, %v656_v28, %v658_v22 }
 0x168   :  { %730 = vmatprep.subr.mxu0 %v682_v30 }
 0x16a   :  { %v793_v31 = vpop.permute.xlu0 %792  ;;  %v652_v32 = vpop.permute.xlu1 %651 }
 0x16b   :  { %v818_v34 = vsel %vm393_vm4, %v791_v29, %v793_v31  ;;  %v819_v35 = vsel %vm393_vm4, %v793_v31, %v795_v26 }
 0x16c   :  { %867 = vmatprep.subr.mxu1 %v819_v35 }
 0x16d   :  { %868 = vmatpush1.msra.mxu1 %v818_v34  ;;  %v207_v1 = vpop.f32.mrf.mxu0 }
 0x16e   :  { %v654_v36 = vpop.permute.xlu0 %653  ;;  %v789_v37 = vpop.permute.xlu1 %788  ;;  %v212_v2 = vmul.f32 %v930_v11, %v207_v1 }
 0x16f   :  { %v681_v40 = vsel %vm254_vm3, %v654_v36, %v656_v28  ;;  %v209_v61 = vpop.f32.mrf.mxu0 }
 0x170   :  { %731 = vmatpush1.msra.mxu0 %v681_v40  ;;  %v213_v63 = vmul.f32 %v931_v62, %v209_v61 }
 0x172   :  { %v650_v41 = vpop.permute.xlu0 %649  ;;  %v785_v42 = vpop.permute.xlu1 %784 }
 0x173   :  { %v680_v45 = vsel %vm254_vm3, %v650_v41, %v652_v32 }
 0x174   :  { %732 = vmatprep.subr.mxu0 %v680_v45 }
 0x176   :  { %v787_v46 = vpop.permute.xlu0 %786  ;;  %v646_v47 = vpop.permute.xlu1 %645 }
 0x177   :  { %v816_v48 = vsel %vm393_vm4, %v785_v42, %v787_v46  ;;  %v817_v51 = vsel %vm393_vm4, %v787_v46, %v789_v37 }
 0x178   :  { %869 = vmatprep.subr.mxu1 %v817_v51 }
 0x179   :  { %870 = vmatpush1.msra.mxu1 %v816_v48 }
 0x17a   :  { %v648_v52 = vpop.permute.xlu0 %647  ;;  %v783_v54 = vpop.permute.xlu1 %782 }
 0x17b   :  { %v679_v53 = vsel %vm254_vm3, %v648_v52, %v650_v41 }
 0x17c   :  { %733 = vmatpush1.msra.mxu0 %v679_v53 }
 0x17e   :  { %v644_v57 = vpop.permute.xlu0 %643  ;;  %v779_v38 = vpop.permute.xlu1 %778 }
 0x17f   :  { %v678_v39 = vsel %vm254_vm3, %v644_v57, %v646_v47 }
 0x180   :  { %734 = vmatprep.subr.mxu0 %v678_v39 }
 0x182   :  { %v781_v43 = vpop.permute.xlu0 %780 }
 0x183   :  { %v814_v58 = vsel %vm393_vm4, %v779_v38, %v781_v43  ;;  %v815_v44 = vsel %vm393_vm4, %v781_v43, %v783_v54 }
 0x184   :  { %871 = vmatprep.subr.mxu1 %v815_v44 }
 0x185   :  { %872 = vmatpush1.msra.mxu1 %v814_v58 }
 0x186   :  { %v642_v60 = vpop.permute.xlu0 %641  ;;  %939 = vmatmul.mubr.msk.f32.vlgmr.msra.gmra.mxu1 %vm137_vm2, %v777_v49 }
 0x187   :  { %v677_v55 = vsel %vm254_vm3, %v642_v60, %v644_v57 }
 0x188   :  { %735 = vmatpush1.msra.mxu0 %v677_v55 }
 0x189   :  { %938 = vmatmul.mubr.msk.f32.vlgmr.msra.gmra.mxu0 %vm137_vm2, %v640_v50 }
 0x193   :  { %v499_v15 = vpop.permute.xlu0 %498 }
 0x1f7   :  { %v348_v0 = vpop.f32.mrf.mxu1 }
 0x1f8   :  { %v353_v5 = vadd.f32 %v348_v0, %v212_v2 }
 0x1f9   :  { %v350_v4 = vpop.f32.mrf.mxu1 }
 0x1fa   :  { %v354_v13 = vadd.f32 %v350_v4, %v213_v63 }
 0x203   :  { %v631_v22 = vpop.f32.mrf.mxu1 }
 0x204   :  { %v636_v25 = vmul.f32 %v930_v11, %v631_v22 }
 0x205   :  { %v633_v23 = vpop.f32.mrf.mxu1 }
 0x206   :  { %v637_v28 = vmul.f32 %v931_v62, %v633_v23 }
 0x207   :  { %v487_v6 = vpop.f32.mrf.mxu0 }
 0x208   :  { %v492_v12 = vmul.f32 %v932_v3, %v487_v6 }
 0x209   :  { %v489_v14 = vpop.f32.mrf.mxu0 }
 0x20a   :  { %v494_v16 = vadd.f32 %v492_v12, %v353_v5  ;;  %v493_v17 = vmul.f32 %v933_v10, %v489_v14 }
 0x20c   :  { %v495_v18 = vadd.f32 %v493_v17, %v354_v13  ;;  %v501_v19 = vadd.f32 %v499_v15, %v494_v16 }
 0x20e   :  { %v502_v20 = vadd.f32 %v499_v15, %v495_v18 }
 0x210   :  { %v505_v21 = vcombine.low %v501_v19, %v502_v20 }
 0x212   :  { %507 = vst [vmem:[%s1357_s3] sm:$0x77] %v505_v21 }
 0x246   :  { %v907_v24 = vpop.f32.mrf.mxu1 }
 0x247   :  { %v912_v26 = vmul.f32 %v932_v3, %v907_v24 }
 0x248   :  { %v909_v27 = vpop.f32.mrf.mxu1 }
 0x249   :  { %v770_v33 = vpop.f32.mrf.mxu0  ;;  %v913_v32 = vmul.f32 %v933_v10, %v909_v27 }
 0x24a   :  { %v775_v29 = vadd.f32 %v770_v33, %v636_v25 }
 0x24b   :  { %v772_v30 = vpop.f32.mrf.mxu0 }
 0x24c   :  { %v914_v31 = vadd.f32 %v912_v26, %v775_v29  ;;  %v776_v34 = vadd.f32 %v772_v30, %v637_v28 }
 0x24e   :  { %v915_v35 = vadd.f32 %v913_v32, %v776_v34  ;;  %v916_v36 = vadd.f32 %v914_v31, %v499_v15 }
 0x250   :  { %v917_v37 = vadd.f32 %v915_v35, %v499_v15 }
 0x252   :  { %v920_v40 = vcombine.low %v916_v36, %v917_v37 }
 0x254   :  { %940 = vst [vmem:[%s1357_s3 + $0x8] sm:$0x77] %v920_v40 }
 0x255   :  { %928 = vsyncpa [#allocation3], 1 }
 0x256   :  { %929 = vsyncpa [#allocation5], 1 }

</bundles_post_ra>
